<compile_context>
chip_gen: v6e
topology: v6e:2x2x1
jax: 0.10.0
libtpu: 0.0.40
codegen_flags: <defaults>
</compile_context>

<pallas_src>
import functools

import jax
import jax.numpy as jnp
from jax.experimental import pallas as pl
from jax.experimental.pallas import tpu as pltpu


# -----------------------------------------------------------------------------
# Per-generation VMEM budget (queried once; ~16 MiB headroom below physical).
# -----------------------------------------------------------------------------
_VMEM_LIMIT = None


def _vmem_limit():
    global _VMEM_LIMIT
    if _VMEM_LIMIT is None:
        cap = 64 * 1024 * 1024                       # conservative fallback (v7x-sized)
        try:
            cap = int(pltpu.get_tpu_info().vmem_capacity_bytes)
        except Exception:
            pass
        _VMEM_LIMIT = max(cap - 16 * 1024 * 1024, 32 * 1024 * 1024)
    return _VMEM_LIMIT


def _pick_th(h, w, target_rows=256):
    """Output-H tile: smallest divisor of h with th*w >= target_rows (full MXU M
    depth), keeping th*w a multiple of 8 (sublane-aligned (th*w, tcout) store)."""
    cands = [t for t in range(1, h + 1) if h % t == 0 and (t * w) % 8 == 0]
    for t in cands:
        if t * w >= target_rows:
            return t
    return cands[-1] if cands else h


# -----------------------------------------------------------------------------
# Kernel 1: 3x3 dilated conv (no bias) + folded BN + ReLU   (NHWC / HWIO, bf16 in)
# -----------------------------------------------------------------------------
def _dilated_conv_bn_relu_kernel(x_ref, w_ref, scale_ref, bias_ref, o_ref, acc_ref,
                                 *, th, w_out, cin, rate, base):
    # grid = (N, Cout-tiles, H-tiles); the whole 3x3 tap reduction runs in-kernel
    # against a resident (9, Cin, tcout) weight block -> one grid step per output tile.
    h_idx = pl.program_id(2)

    acc_ref[...] = jnp.zeros_like(acc_ref)
    for kh in range(3):
        row0 = h_idx * th + base + kh * rate            # offset in the rmax-padded image
        rows = x_ref[0, pl.ds(row0, th), :, :]          # (th, Wp, Cin)
        for kw in range(3):
            c0 = base + kw * rate                       # static column shift
            patch = rows[:, c0:c0 + w_out, :].reshape(th * w_out, cin)
            acc_ref[...] += jnp.dot(patch, w_ref[kh * 3 + kw],
                                    preferred_element_type=jnp.float32)

    y = acc_ref[...] * scale_ref[...] + bias_ref[...]   # folded BN (f32)
    o_ref[0] = jnp.maximum(y, 0.0).astype(o_ref.dtype)  # ReLU, bf16 store


def _dilated_conv_bn_relu(x_pad, w_hwio, scale, bias, *, rate, pad, h, w,
                          tcout=256, out_dtype=jnp.bfloat16):
    """3x3 dilated 'same' conv + BN + ReLU on a shared max-rate zero-padded input.

    x_pad : (N, H+2*pad, W+2*pad, Cin) bf16, pad >= rate.
    Returns (N, H*W, Cout) in `out_dtype` (rows in row-major (h, w) order).
    """
    N, Hp, Wp, Cin = x_pad.shape
    Cout = w_hwio.shape[-1]
    tcout = min(tcout, Cout)
    assert Cout % tcout == 0 and tcout % 128 == 0
    th = _pick_th(h, w)
    base = pad - rate
    w_taps = w_hwio.reshape(9, Cin, Cout).astype(jnp.bfloat16)

    kernel = functools.partial(_dilated_conv_bn_relu_kernel,
                               th=th, w_out=w, cin=Cin, rate=rate, base=base)

    def call(single_buffer_input):
        # Input block index is constant across the Cout/H axes -> DMA'd once per n;
        # a single buffer halves the dominant VMEM consumer (important on v7x).
        xspec_kw = dict(pipeline_mode=pl.Buffered(1)) if single_buffer_input else {}
        return pl.pallas_call(
            kernel,
            out_shape=jax.ShapeDtypeStruct((N, h * w, Cout), out_dtype),
            grid_spec=pltpu.PrefetchScalarGridSpec(
                num_scalar_prefetch=0,
                grid=(N, Cout // tcout, h // th),
                in_specs=[
                    pl.BlockSpec((1, Hp, Wp, Cin),
                                 lambda n, c, hh: (n, 0, 0, 0), **xspec_kw),
                    # Full 3x3 weights for one Cout tile, resident across the H axis.
                    pl.BlockSpec((9, Cin, tcout), lambda n, c, hh: (0, 0, c)),
                    pl.BlockSpec((1, tcout), lambda n, c, hh: (0, c)),
                    pl.BlockSpec((1, tcout), lambda n, c, hh: (0, c)),
                ],
                out_specs=pl.BlockSpec((1, th * w, tcout),
                                       lambda n, c, hh: (n, hh, c)),
                scratch_shapes=[pltpu.VMEM((th * w, tcout), jnp.float32)],
            ),
            compiler_params=pltpu.CompilerParams(
                dimension_semantics=("parallel", "parallel", "parallel"),
                vmem_limit_bytes=_vmem_limit()),
        )(x_pad, w_taps, scale, bias)

    try:
        return call(True)
    except Exception:
        # pipeline_mode / Buffered(1) unsupported on this jax version -> default spec.
        return call(False)


# -----------------------------------------------------------------------------
# Kernel 2: 1x1 conv (no bias) + folded BN + ReLU   (channels-last matmul)
# -----------------------------------------------------------------------------
def _pointwise_conv_bn_relu_kernel(x_ref, w_ref, scale_ref, bias_ref, o_ref):
    y = jnp.dot(x_ref[...], w_ref[...], preferred_element_type=jnp.float32)
    y = y * scale_ref[...] + bias_ref[...]                # folded BN (f32)
    o_ref[...] = jnp.maximum(y, 0.0).astype(o_ref.dtype)  # ReLU


def _pointwise_conv_bn_relu(x_2d, w_io, scale, bias, *, tm=1024, tcout=256,
                            out_dtype=jnp.bfloat16):
    """(M, Cin) @ (Cin, Cout) + BN + ReLU -> (M, Cout)."""
    M, Cin = x_2d.shape
    Cout = w_io.shape[-1]
    tcout = min(tcout, Cout)
    assert Cout % tcout == 0
    tm = min(tm, M)

    return pl.pallas_call(
        _pointwise_conv_bn_relu_kernel,
        out_shape=jax.ShapeDtypeStruct((M, Cout), out_dtype),
        grid_spec=pltpu.PrefetchScalarGridSpec(
            num_scalar_prefetch=0,
            grid=(Cout // tcout, pl.cdiv(M, tm)),     # weights resident across inner M
            in_specs=[
                pl.BlockSpec((tm, Cin), lambda c, m: (m, 0)),
                pl.BlockSpec((Cin, tcout), lambda c, m: (0, c)),
                pl.BlockSpec((1, tcout), lambda c, m: (0, c)),
                pl.BlockSpec((1, tcout), lambda c, m: (0, c)),
            ],
            out_specs=pl.BlockSpec((tm, tcout), lambda c, m: (m, c)),
        ),
        compiler_params=pltpu.CompilerParams(
            dimension_semantics=("parallel", "parallel"),
            vmem_limit_bytes=_vmem_limit()),
    )(x_2d.astype(jnp.bfloat16), w_io.astype(jnp.bfloat16), scale, bias)


# -----------------------------------------------------------------------------
# Kernel 3: projection (concat folded into 4 K-slices + pooled-branch bias) + BN + ReLU
# -----------------------------------------------------------------------------
def _project_kernel(f0_ref, f1_ref, f2_ref, f3_ref,
                    w0_ref, w1_ref, w2_ref, w3_ref,
                    pooled_ref, scale_ref, bias_ref, o_ref):
    acc = jnp.dot(f0_ref[0], w0_ref[...], preferred_element_type=jnp.float32)
    acc = acc + jnp.dot(f1_ref[0], w1_ref[...], preferred_element_type=jnp.float32)
    acc = acc + jnp.dot(f2_ref[0], w2_ref[...], preferred_element_type=jnp.float32)
    acc = acc + jnp.dot(f3_ref[0], w3_ref[...], preferred_element_type=jnp.float32)
    acc = acc + pooled_ref[...]                           # pooled branch (constant over HW)
    y = acc * scale_ref[...] + bias_ref[...]              # folded BN (f32)
    o_ref[0] = jnp.maximum(y, 0.0).astype(o_ref.dtype)    # ReLU


def _project(feats, proj_w, pooled_bias, scale, bias, *, tm=1024, tcout=256,
             out_dtype=jnp.float32):
    """feats: 4 x (N, HW, C) bf16; proj_w: (5C, Cout); pooled_bias: (N, Cout) f32."""
    N, HW, C = feats[0].shape
    Cout = proj_w.shape[-1]
    tcout = min(tcout, Cout)
    assert Cout % tcout == 0
    tm = min(tm, HW)
    w_slabs = [proj_w[i * C:(i + 1) * C].astype(jnp.bfloat16) for i in range(4)]

    feat_spec = pl.BlockSpec((1, tm, C), lambda n, c, m: (n, m, 0))
    w_spec = pl.BlockSpec((C, tcout), lambda n, c, m: (0, c))
    pb_spec = pl.BlockSpec((1, tcout), lambda n, c, m: (n, c))
    sb_spec = pl.BlockSpec((1, tcout), lambda n, c, m: (0, c))

    return pl.pallas_call(
        _project_kernel,
        out_shape=jax.ShapeDtypeStruct((N, HW, Cout), out_dtype),
        grid_spec=pltpu.PrefetchScalarGridSpec(
            num_scalar_prefetch=0,
            grid=(N, Cout // tcout, pl.cdiv(HW, tm)),
            in_specs=[feat_spec] * 4 + [w_spec] * 4 + [pb_spec, sb_spec, sb_spec],
            out_specs=pl.BlockSpec((1, tm, tcout), lambda n, c, m: (n, m, c)),
        ),
        compiler_params=pltpu.CompilerParams(
            dimension_semantics=("parallel", "parallel", "parallel"),
            vmem_limit_bytes=_vmem_limit()),
    )(*feats, *w_slabs, pooled_bias, scale, bias)


# -----------------------------------------------------------------------------
# _ASPP forward
# -----------------------------------------------------------------------------
def _fold_bn(gamma, beta, mean, var, eps=1e-5):
    scale = (gamma / jnp.sqrt(var + eps)).astype(jnp.float32)
    bias = (beta - mean * scale).astype(jnp.float32)
    return scale[None, :], bias[None, :]


def aspp_forward(x_nchw, params, atrous_rates, eps=1e-5):
    """Forward of _ASPP (inference). x_nchw: (N, Cin, H, W) -> (N, 256, H, W) f32."""
    N, Cin, H, W = x_nchw.shape
    Cout = params["b0_w"].shape[-1]
    bf16 = jnp.bfloat16

    # NCHW -> NHWC (lane-friendly), pooled stats in f32, activations bf16 for the MXU.
    # TODO(synk): if the surrounding model stays NHWC these two layout transposes
    # (extra whole-activation HBM passes) disappear entirely.
    x_nhwc = jnp.transpose(x_nchw, (0, 2, 3, 1))
    pooled = jnp.mean(x_nhwc, axis=(1, 2))                          # (N, Cin) f32
    x_bf16 = x_nhwc.astype(bf16)

    # Single shared zero-padded copy (max rate) reused by all three dilated branches.
    rmax = max(atrous_rates)
    x_pad = jnp.pad(x_bf16, ((0, 0), (rmax, rmax), (rmax, rmax), (0, 0)))

    # b0: 1x1 conv + BN + ReLU (bf16 output, consumed only by the projection matmul).
    s, b = _fold_bn(*params["b0_bn"], eps)
    feat1 = _pointwise_conv_bn_relu(
        x_bf16.reshape(N * H * W, Cin), params["b0_w"], s, b, out_dtype=bf16
    ).reshape(N, H * W, Cout)

    # b1..b3: 3x3 dilated conv + BN + ReLU (bf16 outputs).
    feats = [feat1]
    for i, rate in enumerate(atrous_rates):
        s, b = _fold_bn(*params[f"b{i + 1}_bn"], eps)
        feats.append(_dilated_conv_bn_relu(
            x_pad, params[f"b{i + 1}_w"], s, b,
            rate=rate, pad=rmax, h=H, w=W, out_dtype=bf16))

    # b4: GAP -> 1x1 conv + BN + ReLU; bilinear upsample of a 1x1 map == broadcast,
    # and its projection contribution is spatially constant -> fold it into the
    # projection as a per-batch bias instead of materializing a (N,H,W,256) map.
    s, b = _fold_bn(*params["b4_bn"], eps)
    pooled_feat = _pointwise_conv_bn_relu(pooled, params["b4_w"], s, b,
                                          out_dtype=bf16)           # (N, Cout)
    pooled_bias = jnp.dot(pooled_feat, params["proj_w"][4 * Cout:].astype(bf16),
                          preferred_element_type=jnp.float32)       # (N, Cout) f32

    # Projection: channel concat folded as 4 K-slice matmuls + pooled bias.
    # TODO(synk): nn.Dropout(0.5) is treated as inference-mode identity (no RNG drop),
    # consistent with using BatchNorm running statistics.
    s, b = _fold_bn(*params["proj_bn"], eps)
    out = _project(feats, params["proj_w"], pooled_bias, s, b)      # (N, HW, Cout) f32
    out = out.reshape(N, H, W, Cout)
    return jnp.transpose(out, (0, 3, 1, 2))                         # back to NCHW


# -----------------------------------------------------------------------------
# Pure-JAX reference (same bf16 matmul-input policy as the kernels)
# -----------------------------------------------------------------------------
def _reference(x_nchw, params, atrous_rates, eps=1e-5):
    bf16 = jnp.bfloat16
    N, Cin, H, W = x_nchw.shape
    Cout = params["b0_w"].shape[-1]
    x_nhwc = jnp.transpose(x_nchw, (0, 2, 3, 1))

    def bn_relu(y, bn):
        gamma, beta, mean, var = bn
        scale = gamma / jnp.sqrt(var + eps)
        return jnp.maximum(y * scale + (beta - mean * scale), 0.0)

    def pointwise(x2, w, bn):
        y = jnp.dot(x2.astype(bf16), w.astype(bf16),
                    preferred_element_type=jnp.float32)
        return bn_relu(y, bn)

    feat1 = pointwise(x_nhwc.reshape(-1, Cin), params["b0_w"],
                      params["b0_bn"]).reshape(N, H, W, Cout)

    dil_feats = []
    for i, r in enumerate(atrous_rates):
        y = jax.lax.conv_general_dilated(
            x_nhwc.astype(bf16), params[f"b{i + 1}_w"].astype(bf16),
            window_strides=(1, 1), padding=((r, r), (r, r)),
            rhs_dilation=(r, r),
            dimension_numbers=("NHWC", "HWIO", "NHWC"),
            preferred_element_type=jnp.float32)
        dil_feats.append(bn_relu(y, params[f"b{i + 1}_bn"]))

    pooled = jnp.mean(x_nhwc, axis=(1, 2))
    pooled_feat = pointwise(pooled, params["b4_w"], params["b4_bn"])
    feat5 = jnp.broadcast_to(pooled_feat[:, None, None, :], (N, H, W, Cout))

    cat = jnp.concatenate([feat1, *dil_feats, feat5], axis=-1)
    out = pointwise(cat.reshape(-1, 5 * Cout), params["proj_w"],
                    params["proj_bn"]).reshape(N, H, W, Cout)
    return jnp.transpose(out, (0, 3, 1, 2))


if __name__ == "__main__":
    # Small demo shapes consistent with the module (_ASPP hardcodes out_channels=256).
    N, Cin, H, W = 2, 32, 16, 16
    Cout = 256
    atrous_rates = (2, 4, 6)

    key = jax.random.PRNGKey(0)
    keys = jax.random.split(key, 8)

    x = jax.random.normal(keys[0], (N, Cin, H, W), dtype=jnp.float32)

    def make_bn(i, c):
        idx = jnp.arange(c, dtype=jnp.float32)
        return (1.0 + 0.05 * jnp.cos(idx + i),          # gamma
                0.02 * jnp.sin(idx + i),                # beta
                0.01 * jnp.cos(0.5 * idx + i),          # running_mean
                1.0 + 0.03 * jnp.sin(0.3 * idx + i))    # running_var

    params = {
        "b0_w": 0.1 * jax.random.normal(keys[1], (Cin, Cout), jnp.float32),
        "b0_bn": make_bn(0, Cout),
        "b1_w": 0.1 * jax.random.normal(keys[2], (3, 3, Cin, Cout), jnp.float32),
        "b1_bn": make_bn(1, Cout),
        "b2_w": 0.1 * jax.random.normal(keys[3], (3, 3, Cin, Cout), jnp.float32),
        "b2_bn": make_bn(2, Cout),
        "b3_w": 0.1 * jax.random.normal(keys[4], (3, 3, Cin, Cout), jnp.float32),
        "b3_bn": make_bn(3, Cout),
        "b4_w": 0.1 * jax.random.normal(keys[5], (Cin, Cout), jnp.float32),
        "b4_bn": make_bn(4, Cout),
        "proj_w": 0.05 * jax.random.normal(keys[6], (5 * Cout, Cout), jnp.float32),
        "proj_bn": make_bn(5, Cout),
    }

    out = aspp_forward(x, params, atrous_rates)
    out = jax.block_until_ready(out)

    ref = _reference(x, params, atrous_rates)
    assert out.shape == (N, Cout, H, W)
    max_err = float(jnp.max(jnp.abs(out - ref)))
    assert jnp.allclose(out, ref, atol=2e-2, rtol=2e-2), f"max abs err {max_err}"

    print("KERNEL_OK")
</pallas_src>

<mosaic_0001>
module attributes {stable_mosaic.version = 11 : i64} {
  func.func @_pointwise_conv_bn_relu_kernel(%arg0: i32, %arg1: i32, %arg2: memref<512x32xbf16, #tpu.memory_space<vmem>>, %arg3: memref<32x256xbf16, #tpu.memory_space<vmem>>, %arg4: memref<1x256xf32, #tpu.memory_space<vmem>>, %arg5: memref<1x256xf32, #tpu.memory_space<vmem>>, %arg6: memref<512x256xbf16, #tpu.memory_space<vmem>>) attributes {dimension_semantics = [#tpu.dimension_semantics<parallel>, #tpu.dimension_semantics<parallel>], iteration_bounds = array<i64: 1, 1>, scalar_prefetch = 0 : i64, scratch_operands = 0 : i64, tpu.core_type = #tpu.core_type<tc>, window_params = [{transform_indices = @transform_0, window_bounds = array<i64: 512, 32>}, {transform_indices = @transform_1, window_bounds = array<i64: 32, 256>}, {transform_indices = @transform_2, window_bounds = array<i64: 1, 256>}, {transform_indices = @transform_3, window_bounds = array<i64: 1, 256>}, {transform_indices = @transform_4, window_bounds = array<i64: 512, 256>}]} {
    %c0 = arith.constant 0 : index
    %c0_0 = arith.constant 0 : index
    %0 = vector.load %arg2[%c0, %c0_0] : memref<512x32xbf16, #tpu.memory_space<vmem>>, vector<512x32xbf16>
    %c0_1 = arith.constant 0 : index
    %c0_2 = arith.constant 0 : index
    %1 = vector.load %arg3[%c0_1, %c0_2] : memref<32x256xbf16, #tpu.memory_space<vmem>>, vector<32x256xbf16>
    %cst = arith.constant dense<0.000000e+00> : vector<512x256xf32>
    %2 = tpu.matmul %0, %1, %cst {dimension_numbers = #tpu.dot_dimension_numbers<[1], [0], [0], [1], [0, 0, 1, 1], [], []>} : vector<512x32xbf16>, vector<32x256xbf16>, vector<512x256xf32> -> vector<512x256xf32>
    %c0_3 = arith.constant 0 : index
    %c0_4 = arith.constant 0 : index
    %3 = vector.load %arg4[%c0_3, %c0_4] : memref<1x256xf32, #tpu.memory_space<vmem>>, vector<1x256xf32>
    %4 = vector.broadcast %3 : vector<1x256xf32> to vector<512x256xf32>
    %5 = arith.mulf %2, %4 : vector<512x256xf32>
    %c0_5 = arith.constant 0 : index
    %c0_6 = arith.constant 0 : index
    %6 = vector.load %arg5[%c0_5, %c0_6] : memref<1x256xf32, #tpu.memory_space<vmem>>, vector<1x256xf32>
    %7 = vector.broadcast %6 : vector<1x256xf32> to vector<512x256xf32>
    %8 = arith.addf %5, %7 : vector<512x256xf32>
    %cst_7 = arith.constant 0.000000e+00 : f32
    %9 = vector.broadcast %cst_7 : f32 to vector<512x256xf32>
    %10 = arith.maximumf %8, %9 : vector<512x256xf32>
    %11 = arith.truncf %10 : vector<512x256xf32> to vector<512x256xbf16>
    %c0_8 = arith.constant 0 : index
    %c0_9 = arith.constant 0 : index
    %12 = vector.load %arg6[%c0_8, %c0_9] : memref<512x256xbf16, #tpu.memory_space<vmem>>, vector<512x256xbf16>
    tpu.vector_store %arg6[%c0_8, %c0_9], %11 {strides = array<i32>} : memref<512x256xbf16, #tpu.memory_space<vmem>>, vector<512x256xbf16>,
    return
  }
  func.func @transform_0(%arg0: i32, %arg1: i32) -> (i32, i32) {
    %c0_i32 = arith.constant 0 : i32
    %c0_i32_0 = arith.constant 0 : i32
    return %arg1, %c0_i32 : i32, i32
  }
  func.func @transform_1(%arg0: i32, %arg1: i32) -> (i32, i32) {
    %c0_i32 = arith.constant 0 : i32
    %c0_i32_0 = arith.constant 0 : i32
    return %c0_i32, %arg0 : i32, i32
  }
  func.func @transform_2(%arg0: i32, %arg1: i32) -> (i32, i32) {
    %c0_i32 = arith.constant 0 : i32
    %c0_i32_0 = arith.constant 0 : i32
    return %c0_i32, %arg0 : i32, i32
  }
  func.func @transform_3(%arg0: i32, %arg1: i32) -> (i32, i32) {
    %c0_i32 = arith.constant 0 : i32
    %c0_i32_0 = arith.constant 0 : i32
    return %c0_i32, %arg0 : i32, i32
  }
  func.func @transform_4(%arg0: i32, %arg1: i32) -> (i32, i32) {
    %c0_i32 = arith.constant 0 : i32
    return %arg1, %arg0 : i32, i32
  }
}

</mosaic_0001>

<bundles_post_ra>
// kernel: tpu_custom_call.1
= control target key start
LH: loop header
LB: loop body
LE: loop exit
PB: predicated region body
PF: predicated region fallthrough
CT: control target
= control target key end

     0   :  { %v1853_v2 = vmov 0   ;;  %vm267_vm0 = vcmask 261120   ;;  %s2327_s0 = inlined_call_operand.vmem [shape: bf16[512,32], index: 0, kind: input, shape index: {}]   ;;  %s2328_s1 = inlined_call_operand.vmem [shape: bf16[32,256], index: 1, kind: input, shape index: {}]   ;;  %s2329_s2 = inlined_call_operand.vmem [shape: f32[1,256], index: 2, kind: input, shape index: {}]   ;;  %s2330_s3 = inlined_call_operand.vmem [shape: f32[1,256], index: 3, kind: input, shape index: {}]   ;;  %s2331_s4 = inlined_call_operand.hbm [shape: bf16[512,256], index: 4, kind: output, shape index: {}]  }
   0x1   :  { %v1793_v0 = vld [vmem:[%s2328_s1 + $0x14] ss:$8 sps:$4 sm:$0xff]   ;;  %v1795_v1 = vld [vmem:[%s2328_s1 + $0x10] ss:$8 sps:$4 sm:$0xff]   ;;  %396 = vmatprep.mubr.bf16.mxu0 %v1853_v2  ;;  %556 = vmatprep.mubr.bf16.mxu1 %v1853_v2  ;;  %v1796_v3 = vld [vmem:[%s2328_s1 + $0x4] ss:$8 sps:$4 sm:$0xff]  }
   0x2   :  { %376 = vmatprep.subr.bf16.mxu0 %v1793_v0  ;;  %1785 = vmatprep.subr.bf16.mxu1 %v1793_v0  ;;  %v1798_v4 = vld [vmem:[%s2328_s1] ss:$8 sps:$4 sm:$0xff]   ;;  %v1803_v9 = vld [vmem:[%s2327_s0 + $0x10] sm:$0xff]   ;;  %v1805_v11 = vld [vmem:[%s2327_s0 + $0x18] sm:$0xff]  }
   0x3   :  { %377 = vmatpush1.bf16.msra.mxu0 %v1795_v1  ;;  %1787 = vmatpush1.bf16.msra.mxu1 %v1795_v1  ;;  %v1799_v5 = vld [vmem:[%s2327_s0] sm:$0xff]   ;;  %v1801_v7 = vld [vmem:[%s2327_s0 + $0x8] sm:$0xff]   ;;  %v1804_v10 = vld [vmem:[%s2327_s0 + $0x90] sm:$0xff]  }
   0x4   :  { %378 = vmatprep.subr.bf16.mxu0 %v1796_v3  ;;  %1786 = vmatprep.subr.bf16.mxu1 %v1796_v3  ;;  %v1800_v6 = vld [vmem:[%s2327_s0 + $0x80] sm:$0xff]   ;;  %v1802_v8 = vld [vmem:[%s2327_s0 + $0x88] sm:$0xff]   ;;  %v1806_v12 = vld [vmem:[%s2327_s0 + $0x98] sm:$0xff]  }
   0x7   :  { %379 = vmatpush1.bf16.msra.mxu0 %v1798_v4  ;;  %1788 = vmatpush1.bf16.msra.mxu1 %v1798_v4 }
   0xa   :  { %1625 = vmatmul.mubr.msk.bf16.vlgmr.msra.gmra.mxu0 %vm267_vm0, %v1799_v5  ;;  %1641 = vmatmul.mubr.msk.bf16.vlgmr.msra.gmra.mxu1 %vm267_vm0, %v1800_v6 }
   0xb   :  { %406 = vmatprep.mubr.bf16.mxu0 %v1853_v2  ;;  %566 = vmatprep.mubr.bf16.mxu1 %v1853_v2 }
  0x12   :  { %1626 = vmatmul.mubr.msk.bf16.gmra.mxu0 %vm267_vm0, %v1801_v7  ;;  %1642 = vmatmul.mubr.msk.bf16.gmra.mxu1 %vm267_vm0, %v1802_v8 }
  0x13   :  { %416 = vmatprep.mubr.bf16.mxu0 %v1853_v2  ;;  %576 = vmatprep.mubr.bf16.mxu1 %v1853_v2 }
  0x1a   :  { %1627 = vmatmul.mubr.msk.bf16.gmra.mxu0 %vm267_vm0, %v1803_v9  ;;  %1643 = vmatmul.mubr.msk.bf16.gmra.mxu1 %vm267_vm0, %v1804_v10 }
  0x1b   :  { %426 = vmatprep.mubr.bf16.mxu0 %v1853_v2  ;;  %586 = vmatprep.mubr.bf16.mxu1 %v1853_v2 }
  0x22   :  { %1628 = vmatmul.mubr.msk.bf16.gmra.mxu0 %vm267_vm0, %v1805_v11  ;;  %1644 = vmatmul.mubr.msk.bf16.gmra.mxu1 %vm267_vm0, %v1806_v12 }
  0x23   :  { %9 = vsyncpa [#allocation3], 0  ;;  %436 = vmatprep.mubr.bf16.mxu0 %v1853_v2  ;;  %596 = vmatprep.mubr.bf16.mxu1 %v1853_v2  ;;  %v1807_v13 = vld [vmem:[%s2327_s0 + $0x20] sm:$0xff]   ;;  %v1809_v15 = vld [vmem:[%s2327_s0 + $0x28] sm:$0xff]   ;;  %v719_v37 = vlaneseq }
  0x24   :  { %v1808_v14 = vld [vmem:[%s2327_s0 + $0xa0] sm:$0xff]   ;;  %v1810_v16 = vld [vmem:[%s2327_s0 + $0xa8] sm:$0xff]   ;;  %v1811_v17 = vld [vmem:[%s2327_s0 + $0x30] sm:$0xff]  }
  0x25   :  { %v1812_v18 = vld [vmem:[%s2327_s0 + $0xb0] sm:$0xff]   ;;  %v1813_v19 = vld [vmem:[%s2327_s0 + $0x38] sm:$0xff]   ;;  %v1815_v21 = vld [vmem:[%s2327_s0 + $0x40] sm:$0xff]   ;;  %v720_v38 = vshrl.u32 %v719_v37, 7 }
  0x26   :  { %v1814_v20 = vld [vmem:[%s2327_s0 + $0xb8] sm:$0xff]   ;;  %v1816_v22 = vld [vmem:[%s2327_s0 + $0xc0] sm:$0xff]   ;;  %v1817_v23 = vld [vmem:[%s2327_s0 + $0x48] sm:$0xff]  }
  0x27   :  { %v1818_v24 = vld [vmem:[%s2327_s0 + $0xc8] sm:$0xff]   ;;  %v1819_v25 = vld [vmem:[%s2327_s0 + $0x50] sm:$0xff]   ;;  %v1821_v27 = vld [vmem:[%s2327_s0 + $0x58] sm:$0xff]   ;;  %v721_v39 = vsub.s32 0, %v720_v38  ;;  %v725_v41 = vsub.s32 1, %v720_v38 }
  0x28   :  { %v1820_v26 = vld [vmem:[%s2327_s0 + $0xd0] sm:$0xff]   ;;  %v1822_v28 = vld [vmem:[%s2327_s0 + $0xd8] sm:$0xff]   ;;  %v1823_v29 = vld [vmem:[%s2327_s0 + $0x60] sm:$0xff]  }
  0x29   :  { %v1824_v30 = vld [vmem:[%s2327_s0 + $0xe0] sm:$0xff]   ;;  %v1825_v31 = vld [vmem:[%s2327_s0 + $0x68] sm:$0xff]   ;;  %v1827_v33 = vld [vmem:[%s2327_s0 + $0x70] sm:$0xff]  }
  0x2a   :  { %1629 = vmatmul.mubr.msk.bf16.gmra.mxu0 %vm267_vm0, %v1807_v13  ;;  %1645 = vmatmul.mubr.msk.bf16.gmra.mxu1 %vm267_vm0, %v1808_v14  ;;  %v1826_v32 = vld [vmem:[%s2327_s0 + $0xe8] sm:$0xff]   ;;  %v1828_v34 = vld [vmem:[%s2327_s0 + $0xf0] sm:$0xff]   ;;  %v1829_v35 = vld [vmem:[%s2327_s0 + $0x78] sm:$0xff]  }
  0x2b   :  { %446 = vmatprep.mubr.bf16.mxu0 %v1853_v2  ;;  %606 = vmatprep.mubr.bf16.mxu1 %v1853_v2  ;;  %v1830_v36 = vld [vmem:[%s2327_s0 + $0xf8] sm:$0xff]   ;;  %v717_v40 = vld [vmem:[%s2329_s2] sm:$0x3]  ;;  %s1854_s0 = smov [#allocation2]  }
  0x2c   :  { %v857_v42 = vld [vmem:[%s2330_s3] sm:$0x3]  ;;  %v2060_v43 = vrot.slane %v717_v40, %v721_v39  ;;  %v2064_v45 = vrot.slane %v717_v40, %v725_v41  ;;  %s1578_s2 = sshll.u32 %s1854_s0, 4  ;;  %s1579_s2 = int_to_ptr.vmem [resolvable:$true] %s1578_s2 }
  0x2d   :  { %v2062_v44 = vrot.slane %v857_v42, %v721_v39  ;;  %v2068_v50 = vrot.slane %v857_v42, %v725_v41  ;;  %s1831_s3 = scalar_lea.vmem %s1579_s2, 8192  ;;  %p1836_p1 = scmp.lt.s32.totalorder %s1579_s2, %s1579_s2 }
  0x2e   :  { %p1832_p0 = scmp.ne.s32.totalorder %s1579_s2, %s1831_s3  ;;  %p1837_p2 = scmp.lt.s32.totalorder %s1831_s3, %s1831_s3 }
  0x30   :  { %p1838_p3 = por %p1837_p2, %p1836_p1 }
  0x32   :  { %1630 = vmatmul.mubr.msk.bf16.gmra.mxu0 %vm267_vm0, %v1809_v15  ;;  %1646 = vmatmul.mubr.msk.bf16.gmra.mxu1 %vm267_vm0, %v1810_v16  ;;  %p1839_p4 = pnand %p1838_p3, %p1832_p0 }
  0x33   :  { %456 = vmatprep.mubr.bf16.mxu0 %v1853_v2  ;;  %616 = vmatprep.mubr.bf16.mxu1 %v1853_v2 }
  0x3a   :  { %1631 = vmatmul.mubr.msk.bf16.gmra.mxu0 %vm267_vm0, %v1811_v17  ;;  %1647 = vmatmul.mubr.msk.bf16.gmra.mxu1 %vm267_vm0, %v1812_v18 }
  0x3b   :  { %466 = vmatprep.mubr.bf16.mxu0 %v1853_v2  ;;  %626 = vmatprep.mubr.bf16.mxu1 %v1853_v2 }
  0x42   :  { %1632 = vmatmul.mubr.msk.bf16.gmra.mxu0 %vm267_vm0, %v1813_v19  ;;  %1648 = vmatmul.mubr.msk.bf16.gmra.mxu1 %vm267_vm0, %v1814_v20 }
  0x43   :  { %476 = vmatprep.mubr.bf16.mxu0 %v1853_v2  ;;  %636 = vmatprep.mubr.bf16.mxu1 %v1853_v2 }
  0x4a   :  { %1633 = vmatmul.mubr.msk.bf16.gmra.mxu0 %vm267_vm0, %v1815_v21  ;;  %1649 = vmatmul.mubr.msk.bf16.gmra.mxu1 %vm267_vm0, %v1816_v22 }
  0x4b   :  { %486 = vmatprep.mubr.bf16.mxu0 %v1853_v2  ;;  %646 = vmatprep.mubr.bf16.mxu1 %v1853_v2 }
  0x52   :  { %1634 = vmatmul.mubr.msk.bf16.gmra.mxu0 %vm267_vm0, %v1817_v23  ;;  %1650 = vmatmul.mubr.msk.bf16.gmra.mxu1 %vm267_vm0, %v1818_v24 }
  0x53   :  { %496 = vmatprep.mubr.bf16.mxu0 %v1853_v2  ;;  %656 = vmatprep.mubr.bf16.mxu1 %v1853_v2 }
  0x5a   :  { %1635 = vmatmul.mubr.msk.bf16.gmra.mxu0 %vm267_vm0, %v1819_v25  ;;  %1651 = vmatmul.mubr.msk.bf16.gmra.mxu1 %vm267_vm0, %v1820_v26 }
  0x5b   :  { %506 = vmatprep.mubr.bf16.mxu0 %v1853_v2  ;;  %666 = vmatprep.mubr.bf16.mxu1 %v1853_v2 }
  0x62   :  { %1636 = vmatmul.mubr.msk.bf16.gmra.mxu0 %vm267_vm0, %v1821_v27  ;;  %1652 = vmatmul.mubr.msk.bf16.gmra.mxu1 %vm267_vm0, %v1822_v28 }
  0x63   :  { %516 = vmatprep.mubr.bf16.mxu0 %v1853_v2  ;;  %676 = vmatprep.mubr.bf16.mxu1 %v1853_v2 }
  0x6a   :  { %1637 = vmatmul.mubr.msk.bf16.gmra.mxu0 %vm267_vm0, %v1823_v29  ;;  %1653 = vmatmul.mubr.msk.bf16.gmra.mxu1 %vm267_vm0, %v1824_v30 }
  0x6b   :  { %526 = vmatprep.mubr.bf16.mxu0 %v1853_v2  ;;  %686 = vmatprep.mubr.bf16.mxu1 %v1853_v2 }
  0x72   :  { %1638 = vmatmul.mubr.msk.bf16.gmra.mxu0 %vm267_vm0, %v1825_v31  ;;  %1654 = vmatmul.mubr.msk.bf16.gmra.mxu1 %vm267_vm0, %v1826_v32 }
  0x73   :  { %536 = vmatprep.mubr.bf16.mxu0 %v1853_v2  ;;  %696 = vmatprep.mubr.bf16.mxu1 %v1853_v2 }
  0x7a   :  { %1639 = vmatmul.mubr.msk.bf16.gmra.mxu0 %vm267_vm0, %v1827_v33  ;;  %1655 = vmatmul.mubr.msk.bf16.gmra.mxu1 %vm267_vm0, %v1828_v34 }
  0x7b   :  { %546 = vmatprep.mubr.bf16.mxu0 %v1853_v2  ;;  %706 = vmatprep.mubr.bf16.mxu1 %v1853_v2 }
  0x82   :  { %1640 = vmatmul.mubr.msk.bf16.gmra.mxu0 %vm267_vm0, %v1829_v35  ;;  %1656 = vmatmul.mubr.msk.bf16.gmra.mxu1 %vm267_vm0, %v1830_v36 }
  0xca   :  { %v398_v46 = vpop.f32.mrf.mxu0  ;;  %v558_v47 = vpop.f32.mrf.mxu1 }
  0xcb   :  { %v729_v48 = vmul.f32 %v2060_v43, %v398_v46  ;;  %v793_v49 = vmul.f32 %v2060_v43, %v558_v47 }
  0xcc   :  { %v400_v51 = vpop.f32.mrf.mxu0  ;;  %v560_v52 = vpop.f32.mrf.mxu1 }
  0xcd   :  { %v869_v53 = vadd.f32 %v2062_v44, %v729_v48  ;;  %v933_v54 = vadd.f32 %v2062_v44, %v793_v49  ;;  %v730_v55 = vmul.f32 %v2064_v45, %v400_v51  ;;  %v794_v56 = vmul.f32 %v2064_v45, %v560_v52 }
  0xce   :  { %v402_v57 = vpop.f32.mrf.mxu0  ;;  %v562_v58 = vpop.f32.mrf.mxu1 }
  0xcf   :  { %v870_v59 = vadd.f32 %v2068_v50, %v730_v55  ;;  %v934_v60 = vadd.f32 %v2068_v50, %v794_v56  ;;  %v997_v61 = vmax.f32 %v869_v53, 0.0  ;;  %v1061_v62 = vmax.f32 %v933_v54, 0.0 }
  0xd0   :  { %v731_v63 = vmul.f32 %v2060_v43, %v402_v57  ;;  %v795_v0 = vmul.f32 %v2060_v43, %v562_v58  ;;  %v404_v1 = vpop.f32.mrf.mxu0  ;;  %v564_v2 = vpop.f32.mrf.mxu1 }
  0xd1   :  { %v998_v3 = vmax.f32 %v870_v59, 0.0  ;;  %v1062_v4 = vmax.f32 %v934_v60, 0.0  ;;  %v732_v5 = vmul.f32 %v2064_v45, %v404_v1  ;;  %v796_v6 = vmul.f32 %v2064_v45, %v564_v2 }
  0xd2   :  { %v871_v7 = vadd.f32 %v2062_v44, %v731_v63  ;;  %v935_v8 = vadd.f32 %v2062_v44, %v795_v0  ;;  %v408_v9 = vpop.f32.mrf.mxu0  ;;  %v568_v10 = vpop.f32.mrf.mxu1 }
  0xd3   :  { %v1721_v11 = vpack.c.bf16 %v998_v3, %v997_v61  ;;  %v1753_v12 = vpack.c.bf16 %v1062_v4, %v1061_v62  ;;  %v872_v13 = vadd.f32 %v2068_v50, %v732_v5  ;;  %v936_v14 = vadd.f32 %v2068_v50, %v796_v6 }
  0xd4   :  { %v999_v15 = vmax.f32 %v871_v7, 0.0  ;;  %v1063_v16 = vmax.f32 %v935_v8, 0.0  ;;  %v733_v17 = vmul.f32 %v2060_v43, %v408_v9  ;;  %v797_v18 = vmul.f32 %v2060_v43, %v568_v10  ;;  %v410_v19 = vpop.f32.mrf.mxu0  ;;  %v570_v20 = vpop.f32.mrf.mxu1 }
  0xd5   :  { %1509 = vst [vmem:[#allocation2] sm:$0xff] %v1721_v11  ;;  %1541 = vst [vmem:[#allocation2 + $0x100] sm:$0xff] %v1753_v12  ;;  %v1000_v21 = vmax.f32 %v872_v13, 0.0  ;;  %v1064_v22 = vmax.f32 %v936_v14, 0.0  ;;  %v734_v23 = vmul.f32 %v2064_v45, %v410_v19  ;;  %v798_v24 = vmul.f32 %v2064_v45, %v570_v20 }
  0xd6   :  { %v873_v25 = vadd.f32 %v2062_v44, %v733_v17  ;;  %v937_v26 = vadd.f32 %v2062_v44, %v797_v18  ;;  %v412_v27 = vpop.f32.mrf.mxu0  ;;  %v572_v28 = vpop.f32.mrf.mxu1 }
  0xd7   :  { %v1722_v29 = vpack.c.bf16 %v1000_v21, %v999_v15  ;;  %v1754_v30 = vpack.c.bf16 %v1064_v22, %v1063_v16  ;;  %v874_v31 = vadd.f32 %v2068_v50, %v734_v23  ;;  %v938_v32 = vadd.f32 %v2068_v50, %v798_v24 }
  0xd8   :  { %v1001_v33 = vmax.f32 %v873_v25, 0.0  ;;  %v1065_v34 = vmax.f32 %v937_v26, 0.0  ;;  %v735_v35 = vmul.f32 %v2060_v43, %v412_v27  ;;  %v799_v36 = vmul.f32 %v2060_v43, %v572_v28  ;;  %v414_v37 = vpop.f32.mrf.mxu0  ;;  %v574_v38 = vpop.f32.mrf.mxu1 }
  0xd9   :  { %1510 = vst [vmem:[#allocation2 + $0x8] sm:$0xff] %v1722_v29  ;;  %1542 = vst [vmem:[#allocation2 + $0x108] sm:$0xff] %v1754_v30  ;;  %v1002_v39 = vmax.f32 %v874_v31, 0.0  ;;  %v1066_v40 = vmax.f32 %v938_v32, 0.0  ;;  %v736_v41 = vmul.f32 %v2064_v45, %v414_v37  ;;  %v800_v42 = vmul.f32 %v2064_v45, %v574_v38 }
  0xda   :  { %v875_v46 = vadd.f32 %v2062_v44, %v735_v35  ;;  %v939_v47 = vadd.f32 %v2062_v44, %v799_v36  ;;  %v418_v48 = vpop.f32.mrf.mxu0  ;;  %v578_v49 = vpop.f32.mrf.mxu1 }
  0xdb   :  { %v1723_v51 = vpack.c.bf16 %v1002_v39, %v1001_v33  ;;  %v1755_v52 = vpack.c.bf16 %v1066_v40, %v1065_v34  ;;  %v876_v53 = vadd.f32 %v2068_v50, %v736_v41  ;;  %v940_v54 = vadd.f32 %v2068_v50, %v800_v42 }
  0xdc   :  { %v1003_v55 = vmax.f32 %v875_v46, 0.0  ;;  %v1067_v56 = vmax.f32 %v939_v47, 0.0  ;;  %v737_v57 = vmul.f32 %v2060_v43, %v418_v48  ;;  %v801_v58 = vmul.f32 %v2060_v43, %v578_v49  ;;  %v420_v59 = vpop.f32.mrf.mxu0  ;;  %v580_v60 = vpop.f32.mrf.mxu1 }
  0xdd   :  { %1511 = vst [vmem:[#allocation2 + $0x10] sm:$0xff] %v1723_v51  ;;  %1543 = vst [vmem:[#allocation2 + $0x110] sm:$0xff] %v1755_v52  ;;  %v1004_v61 = vmax.f32 %v876_v53, 0.0  ;;  %v1068_v62 = vmax.f32 %v940_v54, 0.0  ;;  %v738_v63 = vmul.f32 %v2064_v45, %v420_v59  ;;  %v802_v0 = vmul.f32 %v2064_v45, %v580_v60 }
  0xde   :  { %v877_v1 = vadd.f32 %v2062_v44, %v737_v57  ;;  %v941_v2 = vadd.f32 %v2062_v44, %v801_v58  ;;  %v422_v3 = vpop.f32.mrf.mxu0  ;;  %v582_v4 = vpop.f32.mrf.mxu1 }
  0xdf   :  { %v1724_v5 = vpack.c.bf16 %v1004_v61, %v1003_v55  ;;  %v1756_v6 = vpack.c.bf16 %v1068_v62, %v1067_v56  ;;  %v878_v7 = vadd.f32 %v2068_v50, %v738_v63  ;;  %v942_v8 = vadd.f32 %v2068_v50, %v802_v0 }
  0xe0   :  { %v1005_v9 = vmax.f32 %v877_v1, 0.0  ;;  %v1069_v10 = vmax.f32 %v941_v2, 0.0  ;;  %v739_v11 = vmul.f32 %v2060_v43, %v422_v3  ;;  %v803_v12 = vmul.f32 %v2060_v43, %v582_v4  ;;  %v424_v13 = vpop.f32.mrf.mxu0  ;;  %v584_v14 = vpop.f32.mrf.mxu1 }
  0xe1   :  { %1512 = vst [vmem:[#allocation2 + $0x18] sm:$0xff] %v1724_v5  ;;  %1544 = vst [vmem:[#allocation2 + $0x118] sm:$0xff] %v1756_v6  ;;  %v1006_v15 = vmax.f32 %v878_v7, 0.0  ;;  %v1070_v16 = vmax.f32 %v942_v8, 0.0  ;;  %v740_v17 = vmul.f32 %v2064_v45, %v424_v13  ;;  %v804_v18 = vmul.f32 %v2064_v45, %v584_v14 }
  0xe2   :  { %v879_v19 = vadd.f32 %v2062_v44, %v739_v11  ;;  %v943_v20 = vadd.f32 %v2062_v44, %v803_v12  ;;  %v428_v21 = vpop.f32.mrf.mxu0  ;;  %v588_v22 = vpop.f32.mrf.mxu1 }
  0xe3   :  { %v1725_v23 = vpack.c.bf16 %v1006_v15, %v1005_v9  ;;  %v1757_v24 = vpack.c.bf16 %v1070_v16, %v1069_v10  ;;  %v880_v25 = vadd.f32 %v2068_v50, %v740_v17  ;;  %v944_v26 = vadd.f32 %v2068_v50, %v804_v18 }
  0xe4   :  { %v1007_v27 = vmax.f32 %v879_v19, 0.0  ;;  %v1071_v28 = vmax.f32 %v943_v20, 0.0  ;;  %v741_v29 = vmul.f32 %v2060_v43, %v428_v21  ;;  %v805_v30 = vmul.f32 %v2060_v43, %v588_v22  ;;  %v430_v31 = vpop.f32.mrf.mxu0  ;;  %v590_v32 = vpop.f32.mrf.mxu1 }
  0xe5   :  { %1513 = vst [vmem:[#allocation2 + $0x20] sm:$0xff] %v1725_v23  ;;  %1545 = vst [vmem:[#allocation2 + $0x120] sm:$0xff] %v1757_v24  ;;  %v1008_v33 = vmax.f32 %v880_v25, 0.0  ;;  %v1072_v34 = vmax.f32 %v944_v26, 0.0  ;;  %v742_v35 = vmul.f32 %v2064_v45, %v430_v31  ;;  %v806_v36 = vmul.f32 %v2064_v45, %v590_v32 }
  0xe6   :  { %v881_v37 = vadd.f32 %v2062_v44, %v741_v29  ;;  %v945_v38 = vadd.f32 %v2062_v44, %v805_v30  ;;  %v432_v39 = vpop.f32.mrf.mxu0  ;;  %v592_v40 = vpop.f32.mrf.mxu1 }
  0xe7   :  { %v1726_v41 = vpack.c.bf16 %v1008_v33, %v1007_v27  ;;  %v1758_v42 = vpack.c.bf16 %v1072_v34, %v1071_v28  ;;  %v882_v46 = vadd.f32 %v2068_v50, %v742_v35  ;;  %v946_v47 = vadd.f32 %v2068_v50, %v806_v36 }
  0xe8   :  { %v1009_v48 = vmax.f32 %v881_v37, 0.0  ;;  %v1073_v49 = vmax.f32 %v945_v38, 0.0  ;;  %v743_v51 = vmul.f32 %v2060_v43, %v432_v39  ;;  %v807_v52 = vmul.f32 %v2060_v43, %v592_v40  ;;  %v434_v53 = vpop.f32.mrf.mxu0  ;;  %v594_v54 = vpop.f32.mrf.mxu1 }
  0xe9   :  { %1514 = vst [vmem:[#allocation2 + $0x28] sm:$0xff] %v1726_v41  ;;  %1546 = vst [vmem:[#allocation2 + $0x128] sm:$0xff] %v1758_v42  ;;  %v1010_v55 = vmax.f32 %v882_v46, 0.0  ;;  %v1074_v56 = vmax.f32 %v946_v47, 0.0  ;;  %v744_v57 = vmul.f32 %v2064_v45, %v434_v53  ;;  %v808_v58 = vmul.f32 %v2064_v45, %v594_v54 }
  0xea   :  { %v883_v59 = vadd.f32 %v2062_v44, %v743_v51  ;;  %v947_v60 = vadd.f32 %v2062_v44, %v807_v52  ;;  %v438_v61 = vpop.f32.mrf.mxu0  ;;  %v598_v62 = vpop.f32.mrf.mxu1 }
  0xeb   :  { %v1727_v63 = vpack.c.bf16 %v1010_v55, %v1009_v48  ;;  %v1759_v0 = vpack.c.bf16 %v1074_v56, %v1073_v49  ;;  %v884_v1 = vadd.f32 %v2068_v50, %v744_v57  ;;  %v948_v2 = vadd.f32 %v2068_v50, %v808_v58 }
  0xec   :  { %v1011_v3 = vmax.f32 %v883_v59, 0.0  ;;  %v1075_v4 = vmax.f32 %v947_v60, 0.0  ;;  %v745_v5 = vmul.f32 %v2060_v43, %v438_v61  ;;  %v809_v6 = vmul.f32 %v2060_v43, %v598_v62  ;;  %v440_v7 = vpop.f32.mrf.mxu0  ;;  %v600_v8 = vpop.f32.mrf.mxu1 }
  0xed   :  { %1515 = vst [vmem:[#allocation2 + $0x30] sm:$0xff] %v1727_v63  ;;  %1547 = vst [vmem:[#allocation2 + $0x130] sm:$0xff] %v1759_v0  ;;  %v1012_v9 = vmax.f32 %v884_v1, 0.0  ;;  %v1076_v10 = vmax.f32 %v948_v2, 0.0  ;;  %v746_v11 = vmul.f32 %v2064_v45, %v440_v7  ;;  %v810_v12 = vmul.f32 %v2064_v45, %v600_v8 }
  0xee   :  { %v885_v13 = vadd.f32 %v2062_v44, %v745_v5  ;;  %v949_v14 = vadd.f32 %v2062_v44, %v809_v6  ;;  %v442_v15 = vpop.f32.mrf.mxu0  ;;  %v602_v16 = vpop.f32.mrf.mxu1 }
  0xef   :  { %v1728_v17 = vpack.c.bf16 %v1012_v9, %v1011_v3  ;;  %v1760_v18 = vpack.c.bf16 %v1076_v10, %v1075_v4  ;;  %v886_v19 = vadd.f32 %v2068_v50, %v746_v11  ;;  %v950_v20 = vadd.f32 %v2068_v50, %v810_v12 }
  0xf0   :  { %v1013_v21 = vmax.f32 %v885_v13, 0.0  ;;  %v1077_v22 = vmax.f32 %v949_v14, 0.0  ;;  %v747_v23 = vmul.f32 %v2060_v43, %v442_v15  ;;  %v811_v24 = vmul.f32 %v2060_v43, %v602_v16  ;;  %v444_v25 = vpop.f32.mrf.mxu0  ;;  %v604_v26 = vpop.f32.mrf.mxu1 }
  0xf1   :  { %1516 = vst [vmem:[#allocation2 + $0x38] sm:$0xff] %v1728_v17  ;;  %1548 = vst [vmem:[#allocation2 + $0x138] sm:$0xff] %v1760_v18  ;;  %v1014_v27 = vmax.f32 %v886_v19, 0.0  ;;  %v1078_v28 = vmax.f32 %v950_v20, 0.0  ;;  %v748_v29 = vmul.f32 %v2064_v45, %v444_v25  ;;  %v812_v30 = vmul.f32 %v2064_v45, %v604_v26 }
  0xf2   :  { %v887_v31 = vadd.f32 %v2062_v44, %v747_v23  ;;  %v951_v32 = vadd.f32 %v2062_v44, %v811_v24  ;;  %v448_v33 = vpop.f32.mrf.mxu0  ;;  %v608_v34 = vpop.f32.mrf.mxu1 }
  0xf3   :  { %v1729_v35 = vpack.c.bf16 %v1014_v27, %v1013_v21  ;;  %v1761_v36 = vpack.c.bf16 %v1078_v28, %v1077_v22  ;;  %v888_v37 = vadd.f32 %v2068_v50, %v748_v29  ;;  %v952_v38 = vadd.f32 %v2068_v50, %v812_v30 }
  0xf4   :  { %v1015_v39 = vmax.f32 %v887_v31, 0.0  ;;  %v1079_v40 = vmax.f32 %v951_v32, 0.0  ;;  %v749_v41 = vmul.f32 %v2060_v43, %v448_v33  ;;  %v813_v42 = vmul.f32 %v2060_v43, %v608_v34  ;;  %v450_v46 = vpop.f32.mrf.mxu0  ;;  %v610_v47 = vpop.f32.mrf.mxu1 }
  0xf5   :  { %1517 = vst [vmem:[#allocation2 + $0x40] sm:$0xff] %v1729_v35  ;;  %1549 = vst [vmem:[#allocation2 + $0x140] sm:$0xff] %v1761_v36  ;;  %v1016_v48 = vmax.f32 %v888_v37, 0.0  ;;  %v1080_v49 = vmax.f32 %v952_v38, 0.0  ;;  %v750_v51 = vmul.f32 %v2064_v45, %v450_v46  ;;  %v814_v52 = vmul.f32 %v2064_v45, %v610_v47 }
  0xf6   :  { %v889_v53 = vadd.f32 %v2062_v44, %v749_v41  ;;  %v953_v54 = vadd.f32 %v2062_v44, %v813_v42  ;;  %v452_v55 = vpop.f32.mrf.mxu0  ;;  %v612_v56 = vpop.f32.mrf.mxu1 }
  0xf7   :  { %v1730_v57 = vpack.c.bf16 %v1016_v48, %v1015_v39  ;;  %v1762_v58 = vpack.c.bf16 %v1080_v49, %v1079_v40  ;;  %v890_v59 = vadd.f32 %v2068_v50, %v750_v51  ;;  %v954_v60 = vadd.f32 %v2068_v50, %v814_v52 }
  0xf8   :  { %v1017_v61 = vmax.f32 %v889_v53, 0.0  ;;  %v1081_v62 = vmax.f32 %v953_v54, 0.0  ;;  %v751_v63 = vmul.f32 %v2060_v43, %v452_v55  ;;  %v815_v0 = vmul.f32 %v2060_v43, %v612_v56  ;;  %v454_v1 = vpop.f32.mrf.mxu0  ;;  %v614_v2 = vpop.f32.mrf.mxu1 }
  0xf9   :  { %1518 = vst [vmem:[#allocation2 + $0x48] sm:$0xff] %v1730_v57  ;;  %1550 = vst [vmem:[#allocation2 + $0x148] sm:$0xff] %v1762_v58  ;;  %v1018_v3 = vmax.f32 %v890_v59, 0.0  ;;  %v1082_v4 = vmax.f32 %v954_v60, 0.0  ;;  %v752_v5 = vmul.f32 %v2064_v45, %v454_v1  ;;  %v816_v6 = vmul.f32 %v2064_v45, %v614_v2 }
  0xfa   :  { %v891_v7 = vadd.f32 %v2062_v44, %v751_v63  ;;  %v955_v8 = vadd.f32 %v2062_v44, %v815_v0  ;;  %v458_v9 = vpop.f32.mrf.mxu0  ;;  %v618_v10 = vpop.f32.mrf.mxu1 }
  0xfb   :  { %v1731_v11 = vpack.c.bf16 %v1018_v3, %v1017_v61  ;;  %v1763_v12 = vpack.c.bf16 %v1082_v4, %v1081_v62  ;;  %v892_v13 = vadd.f32 %v2068_v50, %v752_v5  ;;  %v956_v14 = vadd.f32 %v2068_v50, %v816_v6 }
  0xfc   :  { %v1019_v15 = vmax.f32 %v891_v7, 0.0  ;;  %v1083_v16 = vmax.f32 %v955_v8, 0.0  ;;  %v753_v17 = vmul.f32 %v2060_v43, %v458_v9  ;;  %v817_v18 = vmul.f32 %v2060_v43, %v618_v10  ;;  %v460_v19 = vpop.f32.mrf.mxu0  ;;  %v620_v20 = vpop.f32.mrf.mxu1 }
  0xfd   :  { %1519 = vst [vmem:[#allocation2 + $0x50] sm:$0xff] %v1731_v11  ;;  %1551 = vst [vmem:[#allocation2 + $0x150] sm:$0xff] %v1763_v12  ;;  %v1020_v21 = vmax.f32 %v892_v13, 0.0  ;;  %v1084_v22 = vmax.f32 %v956_v14, 0.0  ;;  %v754_v23 = vmul.f32 %v2064_v45, %v460_v19  ;;  %v818_v24 = vmul.f32 %v2064_v45, %v620_v20 }
  0xfe   :  { %v893_v25 = vadd.f32 %v2062_v44, %v753_v17  ;;  %v957_v26 = vadd.f32 %v2062_v44, %v817_v18  ;;  %v462_v27 = vpop.f32.mrf.mxu0  ;;  %v622_v28 = vpop.f32.mrf.mxu1 }
  0xff   :  { %v1732_v29 = vpack.c.bf16 %v1020_v21, %v1019_v15  ;;  %v1764_v30 = vpack.c.bf16 %v1084_v22, %v1083_v16  ;;  %v894_v31 = vadd.f32 %v2068_v50, %v754_v23  ;;  %v958_v32 = vadd.f32 %v2068_v50, %v818_v24 }
 0x100   :  { %v1021_v33 = vmax.f32 %v893_v25, 0.0  ;;  %v1085_v34 = vmax.f32 %v957_v26, 0.0  ;;  %v755_v35 = vmul.f32 %v2060_v43, %v462_v27  ;;  %v819_v36 = vmul.f32 %v2060_v43, %v622_v28  ;;  %v464_v37 = vpop.f32.mrf.mxu0  ;;  %v624_v38 = vpop.f32.mrf.mxu1 }
 0x101   :  { %1520 = vst [vmem:[#allocation2 + $0x58] sm:$0xff] %v1732_v29  ;;  %1552 = vst [vmem:[#allocation2 + $0x158] sm:$0xff] %v1764_v30  ;;  %v1022_v39 = vmax.f32 %v894_v31, 0.0  ;;  %v1086_v40 = vmax.f32 %v958_v32, 0.0  ;;  %v756_v41 = vmul.f32 %v2064_v45, %v464_v37  ;;  %v820_v42 = vmul.f32 %v2064_v45, %v624_v38 }
 0x102   :  { %v895_v46 = vadd.f32 %v2062_v44, %v755_v35  ;;  %v959_v47 = vadd.f32 %v2062_v44, %v819_v36  ;;  %v468_v48 = vpop.f32.mrf.mxu0  ;;  %v628_v49 = vpop.f32.mrf.mxu1 }
 0x103   :  { %v1733_v51 = vpack.c.bf16 %v1022_v39, %v1021_v33  ;;  %v1765_v52 = vpack.c.bf16 %v1086_v40, %v1085_v34  ;;  %v896_v53 = vadd.f32 %v2068_v50, %v756_v41  ;;  %v960_v54 = vadd.f32 %v2068_v50, %v820_v42 }
 0x104   :  { %v1023_v55 = vmax.f32 %v895_v46, 0.0  ;;  %v1087_v56 = vmax.f32 %v959_v47, 0.0  ;;  %v757_v57 = vmul.f32 %v2060_v43, %v468_v48  ;;  %v821_v58 = vmul.f32 %v2060_v43, %v628_v49  ;;  %v470_v59 = vpop.f32.mrf.mxu0  ;;  %v630_v60 = vpop.f32.mrf.mxu1 }
 0x105   :  { %1521 = vst [vmem:[#allocation2 + $0x60] sm:$0xff] %v1733_v51  ;;  %1553 = vst [vmem:[#allocation2 + $0x160] sm:$0xff] %v1765_v52  ;;  %v1024_v61 = vmax.f32 %v896_v53, 0.0  ;;  %v1088_v62 = vmax.f32 %v960_v54, 0.0  ;;  %v758_v63 = vmul.f32 %v2064_v45, %v470_v59  ;;  %v822_v0 = vmul.f32 %v2064_v45, %v630_v60 }
 0x106   :  { %v897_v1 = vadd.f32 %v2062_v44, %v757_v57  ;;  %v961_v2 = vadd.f32 %v2062_v44, %v821_v58  ;;  %v472_v3 = vpop.f32.mrf.mxu0  ;;  %v632_v4 = vpop.f32.mrf.mxu1 }
 0x107   :  { %v1734_v5 = vpack.c.bf16 %v1024_v61, %v1023_v55  ;;  %v1766_v6 = vpack.c.bf16 %v1088_v62, %v1087_v56  ;;  %v898_v7 = vadd.f32 %v2068_v50, %v758_v63  ;;  %v962_v8 = vadd.f32 %v2068_v50, %v822_v0 }
 0x108   :  { %v1025_v9 = vmax.f32 %v897_v1, 0.0  ;;  %v1089_v10 = vmax.f32 %v961_v2, 0.0  ;;  %v759_v11 = vmul.f32 %v2060_v43, %v472_v3  ;;  %v823_v12 = vmul.f32 %v2060_v43, %v632_v4  ;;  %v474_v13 = vpop.f32.mrf.mxu0  ;;  %v634_v14 = vpop.f32.mrf.mxu1 }
 0x109   :  { %1522 = vst [vmem:[#allocation2 + $0x68] sm:$0xff] %v1734_v5  ;;  %1554 = vst [vmem:[#allocation2 + $0x168] sm:$0xff] %v1766_v6  ;;  %v1026_v15 = vmax.f32 %v898_v7, 0.0  ;;  %v1090_v16 = vmax.f32 %v962_v8, 0.0  ;;  %v760_v17 = vmul.f32 %v2064_v45, %v474_v13  ;;  %v824_v18 = vmul.f32 %v2064_v45, %v634_v14 }
 0x10a   :  { %v899_v19 = vadd.f32 %v2062_v44, %v759_v11  ;;  %v963_v20 = vadd.f32 %v2062_v44, %v823_v12  ;;  %v478_v21 = vpop.f32.mrf.mxu0  ;;  %v638_v22 = vpop.f32.mrf.mxu1 }
 0x10b   :  { %v1735_v23 = vpack.c.bf16 %v1026_v15, %v1025_v9  ;;  %v1767_v24 = vpack.c.bf16 %v1090_v16, %v1089_v10  ;;  %v900_v25 = vadd.f32 %v2068_v50, %v760_v17  ;;  %v964_v26 = vadd.f32 %v2068_v50, %v824_v18 }
 0x10c   :  { %v1027_v27 = vmax.f32 %v899_v19, 0.0  ;;  %v1091_v28 = vmax.f32 %v963_v20, 0.0  ;;  %v761_v29 = vmul.f32 %v2060_v43, %v478_v21  ;;  %v825_v30 = vmul.f32 %v2060_v43, %v638_v22  ;;  %v480_v31 = vpop.f32.mrf.mxu0  ;;  %v640_v32 = vpop.f32.mrf.mxu1 }
 0x10d   :  { %1523 = vst [vmem:[#allocation2 + $0x70] sm:$0xff] %v1735_v23  ;;  %1555 = vst [vmem:[#allocation2 + $0x170] sm:$0xff] %v1767_v24  ;;  %v1028_v33 = vmax.f32 %v900_v25, 0.0  ;;  %v1092_v34 = vmax.f32 %v964_v26, 0.0  ;;  %v762_v35 = vmul.f32 %v2064_v45, %v480_v31  ;;  %v826_v36 = vmul.f32 %v2064_v45, %v640_v32 }
 0x10e   :  { %v901_v37 = vadd.f32 %v2062_v44, %v761_v29  ;;  %v965_v38 = vadd.f32 %v2062_v44, %v825_v30  ;;  %v482_v39 = vpop.f32.mrf.mxu0  ;;  %v642_v40 = vpop.f32.mrf.mxu1 }
 0x10f   :  { %v1736_v41 = vpack.c.bf16 %v1028_v33, %v1027_v27  ;;  %v1768_v42 = vpack.c.bf16 %v1092_v34, %v1091_v28  ;;  %v902_v46 = vadd.f32 %v2068_v50, %v762_v35  ;;  %v966_v47 = vadd.f32 %v2068_v50, %v826_v36 }
 0x110   :  { %v1029_v48 = vmax.f32 %v901_v37, 0.0  ;;  %v1093_v49 = vmax.f32 %v965_v38, 0.0  ;;  %v763_v51 = vmul.f32 %v2060_v43, %v482_v39  ;;  %v827_v52 = vmul.f32 %v2060_v43, %v642_v40  ;;  %v484_v53 = vpop.f32.mrf.mxu0  ;;  %v644_v54 = vpop.f32.mrf.mxu1 }
 0x111   :  { %1524 = vst [vmem:[#allocation2 + $0x78] sm:$0xff] %v1736_v41  ;;  %1556 = vst [vmem:[#allocation2 + $0x178] sm:$0xff] %v1768_v42  ;;  %v1030_v55 = vmax.f32 %v902_v46, 0.0  ;;  %v1094_v56 = vmax.f32 %v966_v47, 0.0  ;;  %v764_v57 = vmul.f32 %v2064_v45, %v484_v53  ;;  %v828_v58 = vmul.f32 %v2064_v45, %v644_v54 }
 0x112   :  { %v903_v59 = vadd.f32 %v2062_v44, %v763_v51  ;;  %v967_v60 = vadd.f32 %v2062_v44, %v827_v52  ;;  %v488_v61 = vpop.f32.mrf.mxu0  ;;  %v648_v62 = vpop.f32.mrf.mxu1 }
 0x113   :  { %v1737_v63 = vpack.c.bf16 %v1030_v55, %v1029_v48  ;;  %v1769_v0 = vpack.c.bf16 %v1094_v56, %v1093_v49  ;;  %v904_v1 = vadd.f32 %v2068_v50, %v764_v57  ;;  %v968_v2 = vadd.f32 %v2068_v50, %v828_v58 }
 0x114   :  { %v1031_v3 = vmax.f32 %v903_v59, 0.0  ;;  %v1095_v4 = vmax.f32 %v967_v60, 0.0  ;;  %v765_v5 = vmul.f32 %v2060_v43, %v488_v61  ;;  %v829_v6 = vmul.f32 %v2060_v43, %v648_v62  ;;  %v490_v7 = vpop.f32.mrf.mxu0  ;;  %v650_v8 = vpop.f32.mrf.mxu1 }
 0x115   :  { %1525 = vst [vmem:[#allocation2 + $0x80] sm:$0xff] %v1737_v63  ;;  %1557 = vst [vmem:[#allocation2 + $0x180] sm:$0xff] %v1769_v0  ;;  %v1032_v9 = vmax.f32 %v904_v1, 0.0  ;;  %v1096_v10 = vmax.f32 %v968_v2, 0.0  ;;  %v766_v11 = vmul.f32 %v2064_v45, %v490_v7  ;;  %v830_v12 = vmul.f32 %v2064_v45, %v650_v8 }
 0x116   :  { %v905_v13 = vadd.f32 %v2062_v44, %v765_v5  ;;  %v969_v14 = vadd.f32 %v2062_v44, %v829_v6  ;;  %v492_v15 = vpop.f32.mrf.mxu0  ;;  %v652_v16 = vpop.f32.mrf.mxu1 }
 0x117   :  { %v1738_v17 = vpack.c.bf16 %v1032_v9, %v1031_v3  ;;  %v1770_v18 = vpack.c.bf16 %v1096_v10, %v1095_v4  ;;  %v906_v19 = vadd.f32 %v2068_v50, %v766_v11  ;;  %v970_v20 = vadd.f32 %v2068_v50, %v830_v12 }
 0x118   :  { %v1033_v21 = vmax.f32 %v905_v13, 0.0  ;;  %v1097_v22 = vmax.f32 %v969_v14, 0.0  ;;  %v767_v23 = vmul.f32 %v2060_v43, %v492_v15  ;;  %v831_v24 = vmul.f32 %v2060_v43, %v652_v16  ;;  %v494_v25 = vpop.f32.mrf.mxu0  ;;  %v654_v26 = vpop.f32.mrf.mxu1 }
 0x119   :  { %1526 = vst [vmem:[#allocation2 + $0x88] sm:$0xff] %v1738_v17  ;;  %1558 = vst [vmem:[#allocation2 + $0x188] sm:$0xff] %v1770_v18  ;;  %v1034_v27 = vmax.f32 %v906_v19, 0.0  ;;  %v1098_v28 = vmax.f32 %v970_v20, 0.0  ;;  %v768_v29 = vmul.f32 %v2064_v45, %v494_v25  ;;  %v832_v30 = vmul.f32 %v2064_v45, %v654_v26 }
 0x11a   :  { %v907_v31 = vadd.f32 %v2062_v44, %v767_v23  ;;  %v971_v32 = vadd.f32 %v2062_v44, %v831_v24  ;;  %v498_v33 = vpop.f32.mrf.mxu0  ;;  %v658_v34 = vpop.f32.mrf.mxu1 }
 0x11b   :  { %v1739_v35 = vpack.c.bf16 %v1034_v27, %v1033_v21  ;;  %v1771_v36 = vpack.c.bf16 %v1098_v28, %v1097_v22  ;;  %v908_v37 = vadd.f32 %v2068_v50, %v768_v29  ;;  %v972_v38 = vadd.f32 %v2068_v50, %v832_v30 }
 0x11c   :  { %v1035_v39 = vmax.f32 %v907_v31, 0.0  ;;  %v1099_v40 = vmax.f32 %v971_v32, 0.0  ;;  %v769_v41 = vmul.f32 %v2060_v43, %v498_v33  ;;  %v833_v42 = vmul.f32 %v2060_v43, %v658_v34  ;;  %v500_v46 = vpop.f32.mrf.mxu0  ;;  %v660_v47 = vpop.f32.mrf.mxu1 }
 0x11d   :  { %1527 = vst [vmem:[#allocation2 + $0x90] sm:$0xff] %v1739_v35  ;;  %1559 = vst [vmem:[#allocation2 + $0x190] sm:$0xff] %v1771_v36  ;;  %v1036_v48 = vmax.f32 %v908_v37, 0.0  ;;  %v1100_v49 = vmax.f32 %v972_v38, 0.0  ;;  %v770_v51 = vmul.f32 %v2064_v45, %v500_v46  ;;  %v834_v52 = vmul.f32 %v2064_v45, %v660_v47 }
 0x11e   :  { %v909_v53 = vadd.f32 %v2062_v44, %v769_v41  ;;  %v973_v54 = vadd.f32 %v2062_v44, %v833_v42  ;;  %v502_v55 = vpop.f32.mrf.mxu0  ;;  %v662_v56 = vpop.f32.mrf.mxu1 }
 0x11f   :  { %v1740_v57 = vpack.c.bf16 %v1036_v48, %v1035_v39  ;;  %v1772_v58 = vpack.c.bf16 %v1100_v49, %v1099_v40  ;;  %v910_v59 = vadd.f32 %v2068_v50, %v770_v51  ;;  %v974_v60 = vadd.f32 %v2068_v50, %v834_v52 }
 0x120   :  { %v1037_v61 = vmax.f32 %v909_v53, 0.0  ;;  %v1101_v62 = vmax.f32 %v973_v54, 0.0  ;;  %v771_v63 = vmul.f32 %v2060_v43, %v502_v55  ;;  %v835_v0 = vmul.f32 %v2060_v43, %v662_v56  ;;  %v504_v1 = vpop.f32.mrf.mxu0  ;;  %v664_v2 = vpop.f32.mrf.mxu1 }
 0x121   :  { %1528 = vst [vmem:[#allocation2 + $0x98] sm:$0xff] %v1740_v57  ;;  %1560 = vst [vmem:[#allocation2 + $0x198] sm:$0xff] %v1772_v58  ;;  %v1038_v3 = vmax.f32 %v910_v59, 0.0  ;;  %v1102_v4 = vmax.f32 %v974_v60, 0.0  ;;  %v772_v5 = vmul.f32 %v2064_v45, %v504_v1  ;;  %v836_v6 = vmul.f32 %v2064_v45, %v664_v2 }
 0x122   :  { %v911_v7 = vadd.f32 %v2062_v44, %v771_v63  ;;  %v975_v8 = vadd.f32 %v2062_v44, %v835_v0  ;;  %v508_v9 = vpop.f32.mrf.mxu0  ;;  %v668_v10 = vpop.f32.mrf.mxu1 }
 0x123   :  { %v1741_v11 = vpack.c.bf16 %v1038_v3, %v1037_v61  ;;  %v1773_v12 = vpack.c.bf16 %v1102_v4, %v1101_v62  ;;  %v912_v13 = vadd.f32 %v2068_v50, %v772_v5  ;;  %v976_v14 = vadd.f32 %v2068_v50, %v836_v6 }
 0x124   :  { %v1039_v15 = vmax.f32 %v911_v7, 0.0  ;;  %v1103_v16 = vmax.f32 %v975_v8, 0.0  ;;  %v773_v17 = vmul.f32 %v2060_v43, %v508_v9  ;;  %v837_v18 = vmul.f32 %v2060_v43, %v668_v10  ;;  %v510_v19 = vpop.f32.mrf.mxu0  ;;  %v670_v20 = vpop.f32.mrf.mxu1 }
 0x125   :  { %1529 = vst [vmem:[#allocation2 + $0xa0] sm:$0xff] %v1741_v11  ;;  %1561 = vst [vmem:[#allocation2 + $0x1a0] sm:$0xff] %v1773_v12  ;;  %v1040_v21 = vmax.f32 %v912_v13, 0.0  ;;  %v1104_v22 = vmax.f32 %v976_v14, 0.0  ;;  %v774_v23 = vmul.f32 %v2064_v45, %v510_v19  ;;  %v838_v24 = vmul.f32 %v2064_v45, %v670_v20 }
 0x126   :  { %v913_v25 = vadd.f32 %v2062_v44, %v773_v17  ;;  %v977_v26 = vadd.f32 %v2062_v44, %v837_v18  ;;  %v512_v27 = vpop.f32.mrf.mxu0  ;;  %v672_v28 = vpop.f32.mrf.mxu1 }
 0x127   :  { %v1742_v29 = vpack.c.bf16 %v1040_v21, %v1039_v15  ;;  %v1774_v30 = vpack.c.bf16 %v1104_v22, %v1103_v16  ;;  %v914_v31 = vadd.f32 %v2068_v50, %v774_v23  ;;  %v978_v32 = vadd.f32 %v2068_v50, %v838_v24 }
 0x128   :  { %v1041_v33 = vmax.f32 %v913_v25, 0.0  ;;  %v1105_v34 = vmax.f32 %v977_v26, 0.0  ;;  %v775_v35 = vmul.f32 %v2060_v43, %v512_v27  ;;  %v839_v36 = vmul.f32 %v2060_v43, %v672_v28  ;;  %v514_v37 = vpop.f32.mrf.mxu0  ;;  %v674_v38 = vpop.f32.mrf.mxu1 }
 0x129   :  { %1530 = vst [vmem:[#allocation2 + $0xa8] sm:$0xff] %v1742_v29  ;;  %1562 = vst [vmem:[#allocation2 + $0x1a8] sm:$0xff] %v1774_v30  ;;  %v1042_v39 = vmax.f32 %v914_v31, 0.0  ;;  %v1106_v40 = vmax.f32 %v978_v32, 0.0  ;;  %v776_v41 = vmul.f32 %v2064_v45, %v514_v37  ;;  %v840_v42 = vmul.f32 %v2064_v45, %v674_v38 }
 0x12a   :  { %v915_v46 = vadd.f32 %v2062_v44, %v775_v35  ;;  %v979_v47 = vadd.f32 %v2062_v44, %v839_v36  ;;  %v518_v48 = vpop.f32.mrf.mxu0  ;;  %v678_v49 = vpop.f32.mrf.mxu1 }
 0x12b   :  { %v1743_v51 = vpack.c.bf16 %v1042_v39, %v1041_v33  ;;  %v1775_v52 = vpack.c.bf16 %v1106_v40, %v1105_v34  ;;  %v916_v53 = vadd.f32 %v2068_v50, %v776_v41  ;;  %v980_v54 = vadd.f32 %v2068_v50, %v840_v42 }
 0x12c   :  { %v1043_v55 = vmax.f32 %v915_v46, 0.0  ;;  %v1107_v56 = vmax.f32 %v979_v47, 0.0  ;;  %v777_v57 = vmul.f32 %v2060_v43, %v518_v48  ;;  %v841_v58 = vmul.f32 %v2060_v43, %v678_v49  ;;  %v520_v59 = vpop.f32.mrf.mxu0  ;;  %v680_v60 = vpop.f32.mrf.mxu1 }
 0x12d   :  { %1531 = vst [vmem:[#allocation2 + $0xb0] sm:$0xff] %v1743_v51  ;;  %1563 = vst [vmem:[#allocation2 + $0x1b0] sm:$0xff] %v1775_v52  ;;  %v1044_v61 = vmax.f32 %v916_v53, 0.0  ;;  %v1108_v62 = vmax.f32 %v980_v54, 0.0  ;;  %v778_v63 = vmul.f32 %v2064_v45, %v520_v59  ;;  %v842_v0 = vmul.f32 %v2064_v45, %v680_v60 }
 0x12e   :  { %v917_v1 = vadd.f32 %v2062_v44, %v777_v57  ;;  %v981_v2 = vadd.f32 %v2062_v44, %v841_v58  ;;  %v522_v3 = vpop.f32.mrf.mxu0  ;;  %v682_v4 = vpop.f32.mrf.mxu1 }
 0x12f   :  { %v1744_v5 = vpack.c.bf16 %v1044_v61, %v1043_v55  ;;  %v1776_v6 = vpack.c.bf16 %v1108_v62, %v1107_v56  ;;  %v918_v7 = vadd.f32 %v2068_v50, %v778_v63  ;;  %v982_v8 = vadd.f32 %v2068_v50, %v842_v0 }
 0x130   :  { %v1045_v9 = vmax.f32 %v917_v1, 0.0  ;;  %v1109_v10 = vmax.f32 %v981_v2, 0.0  ;;  %v779_v11 = vmul.f32 %v2060_v43, %v522_v3  ;;  %v843_v12 = vmul.f32 %v2060_v43, %v682_v4  ;;  %v524_v13 = vpop.f32.mrf.mxu0  ;;  %v684_v14 = vpop.f32.mrf.mxu1 }
 0x131   :  { %1532 = vst [vmem:[#allocation2 + $0xb8] sm:$0xff] %v1744_v5  ;;  %1564 = vst [vmem:[#allocation2 + $0x1b8] sm:$0xff] %v1776_v6  ;;  %v1046_v15 = vmax.f32 %v918_v7, 0.0  ;;  %v1110_v16 = vmax.f32 %v982_v8, 0.0  ;;  %v780_v17 = vmul.f32 %v2064_v45, %v524_v13  ;;  %v844_v18 = vmul.f32 %v2064_v45, %v684_v14 }
 0x132   :  { %v919_v19 = vadd.f32 %v2062_v44, %v779_v11  ;;  %v983_v20 = vadd.f32 %v2062_v44, %v843_v12  ;;  %v528_v21 = vpop.f32.mrf.mxu0  ;;  %v688_v22 = vpop.f32.mrf.mxu1 }
 0x133   :  { %v1745_v23 = vpack.c.bf16 %v1046_v15, %v1045_v9  ;;  %v1777_v24 = vpack.c.bf16 %v1110_v16, %v1109_v10  ;;  %v920_v25 = vadd.f32 %v2068_v50, %v780_v17  ;;  %v984_v26 = vadd.f32 %v2068_v50, %v844_v18 }
 0x134   :  { %v1047_v27 = vmax.f32 %v919_v19, 0.0  ;;  %v1111_v28 = vmax.f32 %v983_v20, 0.0  ;;  %v781_v29 = vmul.f32 %v2060_v43, %v528_v21  ;;  %v845_v30 = vmul.f32 %v2060_v43, %v688_v22  ;;  %v530_v31 = vpop.f32.mrf.mxu0  ;;  %v690_v32 = vpop.f32.mrf.mxu1 }
 0x135   :  { %1533 = vst [vmem:[#allocation2 + $0xc0] sm:$0xff] %v1745_v23  ;;  %1565 = vst [vmem:[#allocation2 + $0x1c0] sm:$0xff] %v1777_v24  ;;  %v1048_v33 = vmax.f32 %v920_v25, 0.0  ;;  %v1112_v34 = vmax.f32 %v984_v26, 0.0  ;;  %v782_v35 = vmul.f32 %v2064_v45, %v530_v31  ;;  %v846_v36 = vmul.f32 %v2064_v45, %v690_v32 }
 0x136   :  { %v921_v37 = vadd.f32 %v2062_v44, %v781_v29  ;;  %v985_v38 = vadd.f32 %v2062_v44, %v845_v30  ;;  %v532_v39 = vpop.f32.mrf.mxu0  ;;  %v692_v40 = vpop.f32.mrf.mxu1 }
 0x137   :  { %v1746_v41 = vpack.c.bf16 %v1048_v33, %v1047_v27  ;;  %v1778_v42 = vpack.c.bf16 %v1112_v34, %v1111_v28  ;;  %v922_v46 = vadd.f32 %v2068_v50, %v782_v35  ;;  %v986_v47 = vadd.f32 %v2068_v50, %v846_v36 }
 0x138   :  { %v1049_v48 = vmax.f32 %v921_v37, 0.0  ;;  %v1113_v49 = vmax.f32 %v985_v38, 0.0  ;;  %v783_v51 = vmul.f32 %v2060_v43, %v532_v39  ;;  %v847_v52 = vmul.f32 %v2060_v43, %v692_v40  ;;  %v534_v53 = vpop.f32.mrf.mxu0  ;;  %v694_v54 = vpop.f32.mrf.mxu1 }
 0x139   :  { %1534 = vst [vmem:[#allocation2 + $0xc8] sm:$0xff] %v1746_v41  ;;  %1566 = vst [vmem:[#allocation2 + $0x1c8] sm:$0xff] %v1778_v42  ;;  %v1050_v55 = vmax.f32 %v922_v46, 0.0  ;;  %v1114_v56 = vmax.f32 %v986_v47, 0.0  ;;  %v784_v57 = vmul.f32 %v2064_v45, %v534_v53  ;;  %v848_v58 = vmul.f32 %v2064_v45, %v694_v54 }
 0x13a   :  { %v923_v59 = vadd.f32 %v2062_v44, %v783_v51  ;;  %v987_v60 = vadd.f32 %v2062_v44, %v847_v52  ;;  %v538_v61 = vpop.f32.mrf.mxu0  ;;  %v698_v62 = vpop.f32.mrf.mxu1 }
 0x13b   :  { %v1747_v63 = vpack.c.bf16 %v1050_v55, %v1049_v48  ;;  %v1779_v0 = vpack.c.bf16 %v1114_v56, %v1113_v49  ;;  %v924_v1 = vadd.f32 %v2068_v50, %v784_v57  ;;  %v988_v2 = vadd.f32 %v2068_v50, %v848_v58 }
 0x13c   :  { %v1051_v3 = vmax.f32 %v923_v59, 0.0  ;;  %v1115_v4 = vmax.f32 %v987_v60, 0.0  ;;  %v785_v5 = vmul.f32 %v2060_v43, %v538_v61  ;;  %v849_v6 = vmul.f32 %v2060_v43, %v698_v62  ;;  %v540_v7 = vpop.f32.mrf.mxu0  ;;  %v700_v8 = vpop.f32.mrf.mxu1 }
 0x13d   :  { %1535 = vst [vmem:[#allocation2 + $0xd0] sm:$0xff] %v1747_v63  ;;  %1567 = vst [vmem:[#allocation2 + $0x1d0] sm:$0xff] %v1779_v0  ;;  %v1052_v9 = vmax.f32 %v924_v1, 0.0  ;;  %v1116_v10 = vmax.f32 %v988_v2, 0.0  ;;  %v786_v11 = vmul.f32 %v2064_v45, %v540_v7  ;;  %v850_v12 = vmul.f32 %v2064_v45, %v700_v8 }
 0x13e   :  { %v925_v13 = vadd.f32 %v2062_v44, %v785_v5  ;;  %v989_v14 = vadd.f32 %v2062_v44, %v849_v6  ;;  %v542_v15 = vpop.f32.mrf.mxu0  ;;  %v702_v16 = vpop.f32.mrf.mxu1 }
 0x13f   :  { %v1748_v17 = vpack.c.bf16 %v1052_v9, %v1051_v3  ;;  %v1780_v18 = vpack.c.bf16 %v1116_v10, %v1115_v4  ;;  %v926_v19 = vadd.f32 %v2068_v50, %v786_v11  ;;  %v990_v20 = vadd.f32 %v2068_v50, %v850_v12 }
 0x140   :  { %v1053_v21 = vmax.f32 %v925_v13, 0.0  ;;  %v1117_v22 = vmax.f32 %v989_v14, 0.0  ;;  %v787_v23 = vmul.f32 %v2060_v43, %v542_v15  ;;  %v851_v24 = vmul.f32 %v2060_v43, %v702_v16  ;;  %v544_v25 = vpop.f32.mrf.mxu0  ;;  %v704_v26 = vpop.f32.mrf.mxu1 }
 0x141   :  { %1536 = vst [vmem:[#allocation2 + $0xd8] sm:$0xff] %v1748_v17  ;;  %1568 = vst [vmem:[#allocation2 + $0x1d8] sm:$0xff] %v1780_v18  ;;  %v1054_v27 = vmax.f32 %v926_v19, 0.0  ;;  %v1118_v28 = vmax.f32 %v990_v20, 0.0  ;;  %v788_v29 = vmul.f32 %v2064_v45, %v544_v25  ;;  %v852_v30 = vmul.f32 %v2064_v45, %v704_v26 }
 0x142   :  { %v927_v31 = vadd.f32 %v2062_v44, %v787_v23  ;;  %v991_v32 = vadd.f32 %v2062_v44, %v851_v24  ;;  %v548_v33 = vpop.f32.mrf.mxu0  ;;  %v708_v34 = vpop.f32.mrf.mxu1 }
 0x143   :  { %v1749_v35 = vpack.c.bf16 %v1054_v27, %v1053_v21  ;;  %v1781_v36 = vpack.c.bf16 %v1118_v28, %v1117_v22  ;;  %v928_v37 = vadd.f32 %v2068_v50, %v788_v29  ;;  %v992_v38 = vadd.f32 %v2068_v50, %v852_v30 }
 0x144   :  { %v1055_v39 = vmax.f32 %v927_v31, 0.0  ;;  %v1119_v40 = vmax.f32 %v991_v32, 0.0  ;;  %v789_v41 = vmul.f32 %v2060_v43, %v548_v33  ;;  %v853_v42 = vmul.f32 %v2060_v43, %v708_v34  ;;  %v550_v46 = vpop.f32.mrf.mxu0  ;;  %v710_v47 = vpop.f32.mrf.mxu1 }
 0x145   :  { %1537 = vst [vmem:[#allocation2 + $0xe0] sm:$0xff] %v1749_v35  ;;  %1569 = vst [vmem:[#allocation2 + $0x1e0] sm:$0xff] %v1781_v36  ;;  %v1056_v48 = vmax.f32 %v928_v37, 0.0  ;;  %v1120_v49 = vmax.f32 %v992_v38, 0.0  ;;  %v790_v51 = vmul.f32 %v2064_v45, %v550_v46  ;;  %v854_v52 = vmul.f32 %v2064_v45, %v710_v47 }
 0x146   :  { %v929_v53 = vadd.f32 %v2062_v44, %v789_v41  ;;  %v993_v54 = vadd.f32 %v2062_v44, %v853_v42  ;;  %v552_v55 = vpop.f32.mrf.mxu0  ;;  %v712_v56 = vpop.f32.mrf.mxu1 }
 0x147   :  { %v1750_v57 = vpack.c.bf16 %v1056_v48, %v1055_v39  ;;  %v1782_v58 = vpack.c.bf16 %v1120_v49, %v1119_v40  ;;  %v930_v59 = vadd.f32 %v2068_v50, %v790_v51  ;;  %v994_v60 = vadd.f32 %v2068_v50, %v854_v52 }
 0x148   :  { %v1057_v61 = vmax.f32 %v929_v53, 0.0  ;;  %v1121_v62 = vmax.f32 %v993_v54, 0.0  ;;  %v791_v63 = vmul.f32 %v2060_v43, %v552_v55  ;;  %v855_v0 = vmul.f32 %v2060_v43, %v712_v56  ;;  %v554_v1 = vpop.f32.mrf.mxu0  ;;  %v714_v2 = vpop.f32.mrf.mxu1 }
 0x149   :  { %1538 = vst [vmem:[#allocation2 + $0xe8] sm:$0xff] %v1750_v57  ;;  %1570 = vst [vmem:[#allocation2 + $0x1e8] sm:$0xff] %v1782_v58  ;;  %v1058_v3 = vmax.f32 %v930_v59, 0.0  ;;  %v1122_v4 = vmax.f32 %v994_v60, 0.0  ;;  %v792_v5 = vmul.f32 %v2064_v45, %v554_v1  ;;  %v856_v6 = vmul.f32 %v2064_v45, %v714_v2 }
 0x14a   :  { %v931_v7 = vadd.f32 %v2062_v44, %v791_v63  ;;  %v995_v8 = vadd.f32 %v2062_v44, %v855_v0 }
 0x14b   :  { %v1751_v9 = vpack.c.bf16 %v1058_v3, %v1057_v61  ;;  %v1783_v10 = vpack.c.bf16 %v1122_v4, %v1121_v62  ;;  %v932_v11 = vadd.f32 %v2068_v50, %v792_v5  ;;  %v996_v43 = vadd.f32 %v2068_v50, %v856_v6 }
 0x14c   :  { %v1059_v12 = vmax.f32 %v931_v7, 0.0  ;;  %v1123_v13 = vmax.f32 %v995_v8, 0.0 }
 0x14d   :  { %1539 = vst [vmem:[#allocation2 + $0xf0] sm:$0xff] %v1751_v9  ;;  %1571 = vst [vmem:[#allocation2 + $0x1f0] sm:$0xff] %v1783_v10  ;;  %v1060_v14 = vmax.f32 %v932_v11, 0.0  ;;  %v1124_v15 = vmax.f32 %v996_v43, 0.0 }
 0x14f   :  { %v1752_v16 = vpack.c.bf16 %v1060_v14, %v1059_v12  ;;  %v1784_v45 = vpack.c.bf16 %v1124_v15, %v1123_v13 }
 0x151   :  { %1540 = vst [vmem:[#allocation2 + $0xf8] sm:$0xff] %v1752_v16  ;;  %1572 = vst [vmem:[#allocation2 + $0x1f8] sm:$0xff] %v1784_v45 }
 0x152   :  { %1842 = shalt.err (!%p1839_p4)
}
 0x153   :  { %s1855_s10 = smov 128   ;;  %s1856_s11 = smov 8  }
 0x154   :  { %1584 = dma.vmem_to_hbm [thread:$0]  %s1579_s2, 8192, %s2331_s4, [#allocation3], %s1855_s10, %s1855_s10, %s1856_s11  }
 0x155   :  { %1851 = dma.done.wait [#allocation3], 8192  }
 0x156   :  { %1852 = vsyncadd [#allocation3], 4294959104 }
 0x157   :  { %1588 = vsyncpa [#allocation3], 1 }

</bundles_post_ra>
